<compile_context>
chip_gen: v6e
topology: v6e:2x2x1
jax: 0.10.0
libtpu: 0.0.40
codegen_flags: <defaults>
</compile_context>

<pallas_src>
import functools

import numpy as np
import jax
import jax.numpy as jnp
from jax.experimental import pallas as pl
from jax.experimental.pallas import tpu as pltpu


# ----------------------------- static helpers ------------------------------

def _round_up(x, m):
    return ((x + m - 1) // m) * m


def _tap_offsets(W):
    """Flat-index offsets (row-major H*W) of the 9 taps of a 3x3 conv."""
    return tuple((kh - 1) * W + (kw - 1) for kh in range(3) for kw in range(3))


def _tap_masks(H, W):
    """(9, H*W) float32 0/1 validity masks implementing zero padding."""
    hh, ww = np.meshgrid(np.arange(H), np.arange(W), indexing="ij")
    hh = hh.reshape(-1)
    ww = ww.reshape(-1)
    masks = np.zeros((9, H * W), np.float32)
    for kh in range(3):
        for kw in range(3):
            dh, dw = kh - 1, kw - 1
            valid = ((hh + dh >= 0) & (hh + dh < H) &
                     (ww + dw >= 0) & (ww + dw < W))
            masks[kh * 3 + kw, :] = valid.astype(np.float32)
    return masks


def _dual_tensorcore_chip():
    """True on chips with 2 TensorCores per chip (v7x-class)."""
    try:
        kind = jax.devices()[0].device_kind.lower()
    except Exception:
        return False
    return ("v7" in kind) or ("7x" in kind)


def _pick_images_per_block(N):
    """Images per grid step.

    Single-TC chips (v5e/v6e): fold the whole (small) batch into one grid
    step to kill the ~0.35us/step fixed overhead.  Dual-TC chips (v7x):
    keep >= 2 parallel grid steps so both TensorCores get work.
    """
    min_steps = 2 if (_dual_tensorcore_chip() and N >= 2) else 1
    nb = max(1, N // min_steps)
    nb = min(nb, 8)               # VMEM guard for large batches
    while N % nb:
        nb -= 1
    return nb


# ------------------------- host-side param folding -------------------------

def _fold_weights(w_hwio, cpad):
    """HWIO (3,3,Cin,Cout) -> (Cpad, 9*Cpad): one matrix for the whole conv.

    Row o, column t*Cpad + i  ==  w[kh, kw, i, o]  with t = kh*3 + kw.
    Padded rows/cols are zero so padded channels stay exactly zero.
    """
    kh, kw, cin, cout = w_hwio.shape
    w = jnp.transpose(jnp.asarray(w_hwio, jnp.float32), (3, 0, 1, 2))
    w = w.reshape(cout, kh * kw, cin)
    w = jnp.pad(w, ((0, cpad - cout), (0, 0), (0, cpad - cin)))
    return w.reshape(cpad, kh * kw * cpad)


def _fold_bias(b, cpad):
    b = jnp.asarray(b, jnp.float32)
    return jnp.pad(b, (0, cpad - b.shape[0])).reshape(cpad, 1)


# ----------------------------- layout plumbing ------------------------------

def _to_slab(x_nchw, cpad):
    """(N, C, H, W) -> (Cpad, N*H*W): channels on sublanes, batch*spatial on
    lanes.  Pure layout; tiny tensors, fused inside the surrounding jit."""
    N, C, H, W = x_nchw.shape
    x = x_nchw.reshape(N, C, H * W)
    if cpad > C:
        x = jnp.pad(x, ((0, 0), (0, cpad - C), (0, 0)))
    return jnp.transpose(x, (1, 0, 2)).reshape(cpad, N * H * W)


def _from_slab(y, N, C, H, W):
    cpad = y.shape[0]
    y = y.reshape(cpad, N, H * W)
    y = jnp.transpose(y, (1, 0, 2))[:, :C, :]
    return y.reshape(N, C, H, W)


# ------------------------------ kernel bodies ------------------------------

def _conv3x3_slab(x, w_ref, b_ref, masks, offs):
    """3x3 'same' conv on a channels-on-sublanes, lane-flattened slab.

    x      : (Cpad, L) f32, L = nb*H*W (nb images side by side on lanes)
    w_ref  : (Cpad, 9*Cpad) folded weights
    b_ref  : (Cpad, 1)
    masks  : (9, L) f32 border-validity masks (also mask the image seams)
    returns: (Cpad, L) f32
    """
    L = x.shape[1]
    pieces = []
    for t, off in enumerate(offs):
        if off == 0:
            pieces.append(x)                               # centre tap
        else:
            shifted = pltpu.roll(x, shift=(-off) % L, axis=1)   # XLU rotate
            valid = masks[t:t + 1, :] > 0.5                     # (1, L)
            # where (not mask-multiply): robust to Inf/NaN in wrapped lanes.
            pieces.append(jnp.where(valid, shifted, 0.0))
    slab = jnp.concatenate(pieces, axis=0)                 # (9*Cpad, L), 8-aligned
    w = w_ref[...].astype(jnp.float32)
    acc = jnp.dot(w, slab, preferred_element_type=jnp.float32)   # ONE MXU pass
    return acc + b_ref[...].astype(jnp.float32)


def _mgite_fused_kernel(u_ref, f_ref, aw_ref, ab_ref, sw_ref, sb_ref,
                        masks_ref, out_ref, *, offs):
    """u_new = u + S(f - A(u)) for one lane-block, fully fused in VMEM."""
    u = u_ref[...].astype(jnp.float32)
    f = f_ref[...].astype(jnp.float32)
    masks = masks_ref[...]
    au = _conv3x3_slab(u, aw_ref, ab_ref, masks, offs)
    r = f - au                                             # residual stays in VMEM
    sr = _conv3x3_slab(r, sw_ref, sb_ref, masks, offs)
    out_ref[...] = (u + sr).astype(out_ref.dtype)


def _s_only_kernel(f_ref, sw_ref, sb_ref, masks_ref, out_ref, *, offs):
    """u = S(f) for one lane-block (no zeros tensor ever materialized)."""
    f = f_ref[...].astype(jnp.float32)
    out = _conv3x3_slab(f, sw_ref, sb_ref, masks_ref[...], offs)
    out_ref[...] = out.astype(out_ref.dtype)


# ----------------------------- pallas wrappers -----------------------------

def _fused_call(u2, f2, aw, ab, sw, sb, masks_l, offs, nb, P):
    cpad, l_tot = u2.shape
    L = nb * P
    kern = functools.partial(_mgite_fused_kernel, offs=offs)
    return pl.pallas_call(
        kern,
        out_shape=jax.ShapeDtypeStruct((cpad, l_tot), u2.dtype),
        grid=(l_tot // L,),
        in_specs=[
            pl.BlockSpec((cpad, L), lambda n: (0, n)),            # u slab
            pl.BlockSpec((cpad, L), lambda n: (0, n)),            # f slab
            pl.BlockSpec((cpad, 9 * cpad), lambda n: (0, 0)),     # A folded w
            pl.BlockSpec((cpad, 1), lambda n: (0, 0)),            # A bias
            pl.BlockSpec((cpad, 9 * cpad), lambda n: (0, 0)),     # S folded w
            pl.BlockSpec((cpad, 1), lambda n: (0, 0)),            # S bias
            pl.BlockSpec((9, L), lambda n: (0, 0)),               # border masks
        ],
        out_specs=pl.BlockSpec((cpad, L), lambda n: (0, n)),
        input_output_aliases={0: 0},     # write u_new over u's HBM buffer
        compiler_params=pltpu.CompilerParams(
            dimension_semantics=("parallel",)),
    )(u2, f2, aw, ab, sw, sb, masks_l)


def _s_call(f2, sw, sb, masks_l, offs, nb, P):
    cpad, l_tot = f2.shape
    L = nb * P
    kern = functools.partial(_s_only_kernel, offs=offs)
    return pl.pallas_call(
        kern,
        out_shape=jax.ShapeDtypeStruct((cpad, l_tot), f2.dtype),
        grid=(l_tot // L,),
        in_specs=[
            pl.BlockSpec((cpad, L), lambda n: (0, n)),            # f slab
            pl.BlockSpec((cpad, 9 * cpad), lambda n: (0, 0)),     # S folded w
            pl.BlockSpec((cpad, 1), lambda n: (0, 0)),            # S bias
            pl.BlockSpec((9, L), lambda n: (0, 0)),               # border masks
        ],
        out_specs=pl.BlockSpec((cpad, L), lambda n: (0, n)),
        compiler_params=pltpu.CompilerParams(
            dimension_semantics=("parallel",)),
    )(f2, sw, sb, masks_l)


# --------------------------- jitted forward passes --------------------------

@jax.jit
def _mgite_tuple_forward(u, f, aw, ab, sw, sb, masks_img):
    N, C, H, W = u.shape
    P = H * W
    cpad = aw.shape[0]
    nb = _pick_images_per_block(N)
    offs = _tap_offsets(W)
    u2 = _to_slab(u, cpad)
    f2 = _to_slab(f, cpad)
    masks_l = jnp.tile(masks_img, (1, nb))
    out2 = _fused_call(u2, f2, aw, ab, sw, sb, masks_l, offs, nb, P)
    return _from_slab(out2, N, C, H, W)


@jax.jit
def _mgite_single_forward(f, sw, sb, masks_img):
    N, C, H, W = f.shape
    P = H * W
    cpad = sw.shape[0]
    nb = _pick_images_per_block(N)
    offs = _tap_offsets(W)
    f2 = _to_slab(f, cpad)
    masks_l = jnp.tile(masks_img, (1, nb))
    out2 = _s_call(f2, sw, sb, masks_l, offs, nb, P)
    return _from_slab(out2, N, C, H, W)


# --------------------------------- module ----------------------------------

class MgIte:
    """JAX/Pallas port of MgIte; A and S are Conv2d(C, C, 3, padding=1, bias).

    Parameters are given HWIO: weight (3, 3, Cin, Cout), bias (Cout,).
    Activations are NCHW at the call boundary (PyTorch convention).
    """

    def __init__(self, A_params, S_params):
        A_w, A_b = A_params
        S_w, S_b = S_params
        cin, cout = A_w.shape[2], A_w.shape[3]
        assert cin == cout, "MgIte expects square channel counts"
        self.C = cout
        self.Cpad = _round_up(cout, 8)        # fill 8 sublanes per vreg
        self.A_w = _fold_weights(A_w, self.Cpad)
        self.S_w = _fold_weights(S_w, self.Cpad)
        self.A_b = _fold_bias(A_b, self.Cpad)
        self.S_b = _fold_bias(S_b, self.Cpad)
        self._mask_cache = {}

    def _masks(self, H, W):
        key = (H, W)
        if key not in self._mask_cache:
            self._mask_cache[key] = jnp.asarray(_tap_masks(H, W))
        return self._mask_cache[key]

    def __call__(self, out):
        if isinstance(out, tuple):
            u, f = out                                   # NCHW
            _, _, H, W = u.shape
            u_new = _mgite_tuple_forward(u, f, self.A_w, self.A_b,
                                         self.S_w, self.S_b,
                                         self._masks(H, W))
        else:
            f = out
            _, _, H, W = f.shape
            u_new = _mgite_single_forward(f, self.S_w, self.S_b,
                                          self._masks(H, W))
        return (u_new, f)


# ------------------------- pure-JAX reference -------------------------

def _ref_conv3x3(x_nchw, w_hwio, b):
    w_oihw = jnp.transpose(w_hwio, (3, 2, 0, 1))
    y = jax.lax.conv_general_dilated(
        x_nchw, w_oihw, window_strides=(1, 1), padding=((1, 1), (1, 1)),
        dimension_numbers=("NCHW", "OIHW", "NCHW"))
    return y + b[None, :, None, None]


def _ref_mgite(u, f, A_params, S_params):
    Aw, Ab = A_params
    Sw, Sb = S_params
    r = f - _ref_conv3x3(u, Aw, Ab)
    return u + _ref_conv3x3(r, Sw, Sb)


# --------------------------------- main --------------------------------

if __name__ == "__main__":
    key = jax.random.PRNGKey(0)
    N, C, H, W = 2, 4, 16, 16

    k_u, k_f, k_aw, k_ab, k_sw, k_sb = jax.random.split(key, 6)
    u = jax.random.normal(k_u, (N, C, H, W), jnp.float32)
    f = jax.random.normal(k_f, (N, C, H, W), jnp.float32)

    # Deterministic synthetic parameters for A, S (Conv2d(C, C, 3, padding=1)),
    # stored HWIO = (3, 3, Cin, Cout).
    scale = 1.0 / jnp.sqrt(9.0 * C)
    A_w = jax.random.uniform(k_aw, (3, 3, C, C), jnp.float32, -scale, scale)
    A_b = jax.random.uniform(k_ab, (C,), jnp.float32, -scale, scale)
    S_w = jax.random.uniform(k_sw, (3, 3, C, C), jnp.float32, -scale, scale)
    S_b = jax.random.uniform(k_sb, (C,), jnp.float32, -scale, scale)

    block = MgIte((A_w, A_b), (S_w, S_b))

    # Tuple branch: (u, f) -> (u + S(f - A(u)), f)   [single fused kernel]
    u_out, f_out = block((u, f))
    u_out = jax.block_until_ready(u_out)
    f_out = jax.block_until_ready(f_out)

    # Non-tuple branch: f -> (S(f), f)               [S-only kernel]
    u2_out, _ = block(f)
    u2_out = jax.block_until_ready(u2_out)

    # Sanity-check against a pure-JAX reference.
    u_ref = _ref_mgite(u, f, (A_w, A_b), (S_w, S_b))
    u2_ref = _ref_conv3x3(f, S_w, S_b)
    assert jnp.allclose(f_out, f), "f must pass through unchanged"
    assert jnp.allclose(u_out, u_ref, atol=1e-4, rtol=1e-4)
    assert jnp.allclose(u2_out, u2_ref, atol=1e-4, rtol=1e-4)

    print("KERNEL_OK")
</pallas_src>

<mosaic_0001>
module attributes {stable_mosaic.version = 11 : i64} {
  func.func @_mgite_fused_kernel(%arg0: i32, %arg1: memref<8x512xf32, #tpu.memory_space<vmem>>, %arg2: memref<8x512xf32, #tpu.memory_space<vmem>>, %arg3: memref<8x72xf32, #tpu.memory_space<vmem>>, %arg4: memref<8x1xf32, #tpu.memory_space<vmem>>, %arg5: memref<8x72xf32, #tpu.memory_space<vmem>>, %arg6: memref<8x1xf32, #tpu.memory_space<vmem>>, %arg7: memref<9x512xf32, #tpu.memory_space<vmem>>, %arg8: memref<8x512xf32, #tpu.memory_space<vmem>>) attributes {dimension_semantics = [#tpu.dimension_semantics<parallel>], iteration_bounds = array<i64: 1>, scalar_prefetch = 0 : i64, scratch_operands = 0 : i64, tpu.core_type = #tpu.core_type<tc>, window_params = [{transform_indices = @transform_0, window_bounds = array<i64: 8, 512>}, {transform_indices = @transform_1, window_bounds = array<i64: 8, 512>}, {pipeline_mode = #tpu.pipeline_mode<synchronous>, transform_indices = @transform_2, window_bounds = array<i64: 8, 72>}, {pipeline_mode = #tpu.pipeline_mode<synchronous>, transform_indices = @transform_3, window_bounds = array<i64: 8, 1>}, {pipeline_mode = #tpu.pipeline_mode<synchronous>, transform_indices = @transform_4, window_bounds = array<i64: 8, 72>}, {pipeline_mode = #tpu.pipeline_mode<synchronous>, transform_indices = @transform_5, window_bounds = array<i64: 8, 1>}, {pipeline_mode = #tpu.pipeline_mode<synchronous>, transform_indices = @transform_6, window_bounds = array<i64: 9, 512>}, {transform_indices = @transform_7, window_bounds = array<i64: 8, 512>}]} {
    %c0 = arith.constant 0 : index
    %c0_0 = arith.constant 0 : index
    %0 = vector.load %arg1[%c0, %c0_0] : memref<8x512xf32, #tpu.memory_space<vmem>>, vector<8x512xf32>
    %c0_1 = arith.constant 0 : index
    %c0_2 = arith.constant 0 : index
    %1 = vector.load %arg2[%c0_1, %c0_2] : memref<8x512xf32, #tpu.memory_space<vmem>>, vector<8x512xf32>
    %c0_3 = arith.constant 0 : index
    %c0_4 = arith.constant 0 : index
    %2 = vector.load %arg7[%c0_3, %c0_4] : memref<9x512xf32, #tpu.memory_space<vmem>>, vector<9x512xf32>
    %c17_i32 = arith.constant 17 : i32
    %3 = tpu.dynamic_rotate %0 by %c17_i32 dim 1 : vector<8x512xf32>, i32 -> vector<8x512xf32>
    %4 = vector.extract_strided_slice %2 {offsets = [0, 0], sizes = [1, 512], strides = [1, 1]} : vector<9x512xf32> to vector<1x512xf32>
    %cst = arith.constant 5.000000e-01 : f32
    %5 = vector.broadcast %cst : f32 to vector<1x512xf32>
    %6 = arith.cmpf ogt, %4, %5 : vector<1x512xf32>
    %cst_5 = arith.constant 0.000000e+00 : f32
    %7 = vector.shape_cast %6 : vector<1x512xi1> to vector<1x512xi1>
    %8 = vector.broadcast %7 : vector<1x512xi1> to vector<8x512xi1>
    %9 = vector.broadcast %cst_5 : f32 to vector<8x512xf32>
    %10 = arith.select %8, %3, %9 : vector<8x512xi1>, vector<8x512xf32>
    %c16_i32 = arith.constant 16 : i32
    %11 = tpu.dynamic_rotate %0 by %c16_i32 dim 1 : vector<8x512xf32>, i32 -> vector<8x512xf32>
    %12 = vector.extract_strided_slice %2 {offsets = [1, 0], sizes = [1, 512], strides = [1, 1]} : vector<9x512xf32> to vector<1x512xf32>
    %cst_6 = arith.constant 5.000000e-01 : f32
    %13 = vector.broadcast %cst_6 : f32 to vector<1x512xf32>
    %14 = arith.cmpf ogt, %12, %13 : vector<1x512xf32>
    %cst_7 = arith.constant 0.000000e+00 : f32
    %15 = vector.shape_cast %14 : vector<1x512xi1> to vector<1x512xi1>
    %16 = vector.broadcast %15 : vector<1x512xi1> to vector<8x512xi1>
    %17 = vector.broadcast %cst_7 : f32 to vector<8x512xf32>
    %18 = arith.select %16, %11, %17 : vector<8x512xi1>, vector<8x512xf32>
    %c15_i32 = arith.constant 15 : i32
    %19 = tpu.dynamic_rotate %0 by %c15_i32 dim 1 : vector<8x512xf32>, i32 -> vector<8x512xf32>
    %20 = vector.extract_strided_slice %2 {offsets = [2, 0], sizes = [1, 512], strides = [1, 1]} : vector<9x512xf32> to vector<1x512xf32>
    %cst_8 = arith.constant 5.000000e-01 : f32
    %21 = vector.broadcast %cst_8 : f32 to vector<1x512xf32>
    %22 = arith.cmpf ogt, %20, %21 : vector<1x512xf32>
    %cst_9 = arith.constant 0.000000e+00 : f32
    %23 = vector.shape_cast %22 : vector<1x512xi1> to vector<1x512xi1>
    %24 = vector.broadcast %23 : vector<1x512xi1> to vector<8x512xi1>
    %25 = vector.broadcast %cst_9 : f32 to vector<8x512xf32>
    %26 = arith.select %24, %19, %25 : vector<8x512xi1>, vector<8x512xf32>
    %c1_i32 = arith.constant 1 : i32
    %27 = tpu.dynamic_rotate %0 by %c1_i32 dim 1 : vector<8x512xf32>, i32 -> vector<8x512xf32>
    %28 = vector.extract_strided_slice %2 {offsets = [3, 0], sizes = [1, 512], strides = [1, 1]} : vector<9x512xf32> to vector<1x512xf32>
    %cst_10 = arith.constant 5.000000e-01 : f32
    %29 = vector.broadcast %cst_10 : f32 to vector<1x512xf32>
    %30 = arith.cmpf ogt, %28, %29 : vector<1x512xf32>
    %cst_11 = arith.constant 0.000000e+00 : f32
    %31 = vector.shape_cast %30 : vector<1x512xi1> to vector<1x512xi1>
    %32 = vector.broadcast %31 : vector<1x512xi1> to vector<8x512xi1>
    %33 = vector.broadcast %cst_11 : f32 to vector<8x512xf32>
    %34 = arith.select %32, %27, %33 : vector<8x512xi1>, vector<8x512xf32>
    %c511_i32 = arith.constant 511 : i32
    %35 = tpu.dynamic_rotate %0 by %c511_i32 dim 1 : vector<8x512xf32>, i32 -> vector<8x512xf32>
    %36 = vector.extract_strided_slice %2 {offsets = [5, 0], sizes = [1, 512], strides = [1, 1]} : vector<9x512xf32> to vector<1x512xf32>
    %cst_12 = arith.constant 5.000000e-01 : f32
    %37 = vector.broadcast %cst_12 : f32 to vector<1x512xf32>
    %38 = arith.cmpf ogt, %36, %37 : vector<1x512xf32>
    %cst_13 = arith.constant 0.000000e+00 : f32
    %39 = vector.shape_cast %38 : vector<1x512xi1> to vector<1x512xi1>
    %40 = vector.broadcast %39 : vector<1x512xi1> to vector<8x512xi1>
    %41 = vector.broadcast %cst_13 : f32 to vector<8x512xf32>
    %42 = arith.select %40, %35, %41 : vector<8x512xi1>, vector<8x512xf32>
    %c497_i32 = arith.constant 497 : i32
    %43 = tpu.dynamic_rotate %0 by %c497_i32 dim 1 : vector<8x512xf32>, i32 -> vector<8x512xf32>
    %44 = vector.extract_strided_slice %2 {offsets = [6, 0], sizes = [1, 512], strides = [1, 1]} : vector<9x512xf32> to vector<1x512xf32>
    %cst_14 = arith.constant 5.000000e-01 : f32
    %45 = vector.broadcast %cst_14 : f32 to vector<1x512xf32>
    %46 = arith.cmpf ogt, %44, %45 : vector<1x512xf32>
    %cst_15 = arith.constant 0.000000e+00 : f32
    %47 = vector.shape_cast %46 : vector<1x512xi1> to vector<1x512xi1>
    %48 = vector.broadcast %47 : vector<1x512xi1> to vector<8x512xi1>
    %49 = vector.broadcast %cst_15 : f32 to vector<8x512xf32>
    %50 = arith.select %48, %43, %49 : vector<8x512xi1>, vector<8x512xf32>
    %c496_i32 = arith.constant 496 : i32
    %51 = tpu.dynamic_rotate %0 by %c496_i32 dim 1 : vector<8x512xf32>, i32 -> vector<8x512xf32>
    %52 = vector.extract_strided_slice %2 {offsets = [7, 0], sizes = [1, 512], strides = [1, 1]} : vector<9x512xf32> to vector<1x512xf32>
    %cst_16 = arith.constant 5.000000e-01 : f32
    %53 = vector.broadcast %cst_16 : f32 to vector<1x512xf32>
    %54 = arith.cmpf ogt, %52, %53 : vector<1x512xf32>
    %cst_17 = arith.constant 0.000000e+00 : f32
    %55 = vector.shape_cast %54 : vector<1x512xi1> to vector<1x512xi1>
    %56 = vector.broadcast %55 : vector<1x512xi1> to vector<8x512xi1>
    %57 = vector.broadcast %cst_17 : f32 to vector<8x512xf32>
    %58 = arith.select %56, %51, %57 : vector<8x512xi1>, vector<8x512xf32>
    %c495_i32 = arith.constant 495 : i32
    %59 = tpu.dynamic_rotate %0 by %c495_i32 dim 1 : vector<8x512xf32>, i32 -> vector<8x512xf32>
    %60 = vector.extract_strided_slice %2 {offsets = [8, 0], sizes = [1, 512], strides = [1, 1]} : vector<9x512xf32> to vector<1x512xf32>
    %cst_18 = arith.constant 5.000000e-01 : f32
    %61 = vector.broadcast %cst_18 : f32 to vector<1x512xf32>
    %62 = arith.cmpf ogt, %60, %61 : vector<1x512xf32>
    %cst_19 = arith.constant 0.000000e+00 : f32
    %63 = vector.shape_cast %62 : vector<1x512xi1> to vector<1x512xi1>
    %64 = vector.broadcast %63 : vector<1x512xi1> to vector<8x512xi1>
    %65 = vector.broadcast %cst_19 : f32 to vector<8x512xf32>
    %66 = arith.select %64, %59, %65 : vector<8x512xi1>, vector<8x512xf32>
    %67 = tpu.concatenate %10, %18, %26, %34, %0, %42, %50, %58, %66 in 0 : vector<8x512xf32>, vector<8x512xf32>, vector<8x512xf32>, vector<8x512xf32>, vector<8x512xf32>, vector<8x512xf32>, vector<8x512xf32>, vector<8x512xf32>, vector<8x512xf32> -> vector<72x512xf32>
    %c0_20 = arith.constant 0 : index
    %c0_21 = arith.constant 0 : index
    %68 = vector.load %arg3[%c0_20, %c0_21] : memref<8x72xf32, #tpu.memory_space<vmem>>, vector<8x72xf32>
    %cst_22 = arith.constant dense<0.000000e+00> : vector<8x512xf32>
    %69 = tpu.matmul %68, %67, %cst_22 {dimension_numbers = #tpu.dot_dimension_numbers<[1], [0], [0], [1], [0, 0, 1, 1], [], []>} : vector<8x72xf32>, vector<72x512xf32>, vector<8x512xf32> -> vector<8x512xf32>
    %c0_23 = arith.constant 0 : index
    %c0_24 = arith.constant 0 : index
    %70 = vector.load %arg4[%c0_23, %c0_24] : memref<8x1xf32, #tpu.memory_space<vmem>>, vector<8x1xf32>
    %71 = vector.broadcast %70 : vector<8x1xf32> to vector<8x512xf32>
    %72 = arith.addf %69, %71 : vector<8x512xf32>
    %73 = arith.subf %1, %72 : vector<8x512xf32>
    %c17_i32_25 = arith.constant 17 : i32
    %74 = tpu.dynamic_rotate %73 by %c17_i32_25 dim 1 : vector<8x512xf32>, i32 -> vector<8x512xf32>
    %75 = vector.extract_strided_slice %2 {offsets = [0, 0], sizes = [1, 512], strides = [1, 1]} : vector<9x512xf32> to vector<1x512xf32>
    %cst_26 = arith.constant 5.000000e-01 : f32
    %76 = vector.broadcast %cst_26 : f32 to vector<1x512xf32>
    %77 = arith.cmpf ogt, %75, %76 : vector<1x512xf32>
    %cst_27 = arith.constant 0.000000e+00 : f32
    %78 = vector.shape_cast %77 : vector<1x512xi1> to vector<1x512xi1>
    %79 = vector.broadcast %78 : vector<1x512xi1> to vector<8x512xi1>
    %80 = vector.broadcast %cst_27 : f32 to vector<8x512xf32>
    %81 = arith.select %79, %74, %80 : vector<8x512xi1>, vector<8x512xf32>
    %c16_i32_28 = arith.constant 16 : i32
    %82 = tpu.dynamic_rotate %73 by %c16_i32_28 dim 1 : vector<8x512xf32>, i32 -> vector<8x512xf32>
    %83 = vector.extract_strided_slice %2 {offsets = [1, 0], sizes = [1, 512], strides = [1, 1]} : vector<9x512xf32> to vector<1x512xf32>
    %cst_29 = arith.constant 5.000000e-01 : f32
    %84 = vector.broadcast %cst_29 : f32 to vector<1x512xf32>
    %85 = arith.cmpf ogt, %83, %84 : vector<1x512xf32>
    %cst_30 = arith.constant 0.000000e+00 : f32
    %86 = vector.shape_cast %85 : vector<1x512xi1> to vector<1x512xi1>
    %87 = vector.broadcast %86 : vector<1x512xi1> to vector<8x512xi1>
    %88 = vector.broadcast %cst_30 : f32 to vector<8x512xf32>
    %89 = arith.select %87, %82, %88 : vector<8x512xi1>, vector<8x512xf32>
    %c15_i32_31 = arith.constant 15 : i32
    %90 = tpu.dynamic_rotate %73 by %c15_i32_31 dim 1 : vector<8x512xf32>, i32 -> vector<8x512xf32>
    %91 = vector.extract_strided_slice %2 {offsets = [2, 0], sizes = [1, 512], strides = [1, 1]} : vector<9x512xf32> to vector<1x512xf32>
    %cst_32 = arith.constant 5.000000e-01 : f32
    %92 = vector.broadcast %cst_32 : f32 to vector<1x512xf32>
    %93 = arith.cmpf ogt, %91, %92 : vector<1x512xf32>
    %cst_33 = arith.constant 0.000000e+00 : f32
    %94 = vector.shape_cast %93 : vector<1x512xi1> to vector<1x512xi1>
    %95 = vector.broadcast %94 : vector<1x512xi1> to vector<8x512xi1>
    %96 = vector.broadcast %cst_33 : f32 to vector<8x512xf32>
    %97 = arith.select %95, %90, %96 : vector<8x512xi1>, vector<8x512xf32>
    %c1_i32_34 = arith.constant 1 : i32
    %98 = tpu.dynamic_rotate %73 by %c1_i32_34 dim 1 : vector<8x512xf32>, i32 -> vector<8x512xf32>
    %99 = vector.extract_strided_slice %2 {offsets = [3, 0], sizes = [1, 512], strides = [1, 1]} : vector<9x512xf32> to vector<1x512xf32>
    %cst_35 = arith.constant 5.000000e-01 : f32
    %100 = vector.broadcast %cst_35 : f32 to vector<1x512xf32>
    %101 = arith.cmpf ogt, %99, %100 : vector<1x512xf32>
    %cst_36 = arith.constant 0.000000e+00 : f32
    %102 = vector.shape_cast %101 : vector<1x512xi1> to vector<1x512xi1>
    %103 = vector.broadcast %102 : vector<1x512xi1> to vector<8x512xi1>
    %104 = vector.broadcast %cst_36 : f32 to vector<8x512xf32>
    %105 = arith.select %103, %98, %104 : vector<8x512xi1>, vector<8x512xf32>
    %c511_i32_37 = arith.constant 511 : i32
    %106 = tpu.dynamic_rotate %73 by %c511_i32_37 dim 1 : vector<8x512xf32>, i32 -> vector<8x512xf32>
    %107 = vector.extract_strided_slice %2 {offsets = [5, 0], sizes = [1, 512], strides = [1, 1]} : vector<9x512xf32> to vector<1x512xf32>
    %cst_38 = arith.constant 5.000000e-01 : f32
    %108 = vector.broadcast %cst_38 : f32 to vector<1x512xf32>
    %109 = arith.cmpf ogt, %107, %108 : vector<1x512xf32>
    %cst_39 = arith.constant 0.000000e+00 : f32
    %110 = vector.shape_cast %109 : vector<1x512xi1> to vector<1x512xi1>
    %111 = vector.broadcast %110 : vector<1x512xi1> to vector<8x512xi1>
    %112 = vector.broadcast %cst_39 : f32 to vector<8x512xf32>
    %113 = arith.select %111, %106, %112 : vector<8x512xi1>, vector<8x512xf32>
    %c497_i32_40 = arith.constant 497 : i32
    %114 = tpu.dynamic_rotate %73 by %c497_i32_40 dim 1 : vector<8x512xf32>, i32 -> vector<8x512xf32>
    %115 = vector.extract_strided_slice %2 {offsets = [6, 0], sizes = [1, 512], strides = [1, 1]} : vector<9x512xf32> to vector<1x512xf32>
    %cst_41 = arith.constant 5.000000e-01 : f32
    %116 = vector.broadcast %cst_41 : f32 to vector<1x512xf32>
    %117 = arith.cmpf ogt, %115, %116 : vector<1x512xf32>
    %cst_42 = arith.constant 0.000000e+00 : f32
    %118 = vector.shape_cast %117 : vector<1x512xi1> to vector<1x512xi1>
    %119 = vector.broadcast %118 : vector<1x512xi1> to vector<8x512xi1>
    %120 = vector.broadcast %cst_42 : f32 to vector<8x512xf32>
    %121 = arith.select %119, %114, %120 : vector<8x512xi1>, vector<8x512xf32>
    %c496_i32_43 = arith.constant 496 : i32
    %122 = tpu.dynamic_rotate %73 by %c496_i32_43 dim 1 : vector<8x512xf32>, i32 -> vector<8x512xf32>
    %123 = vector.extract_strided_slice %2 {offsets = [7, 0], sizes = [1, 512], strides = [1, 1]} : vector<9x512xf32> to vector<1x512xf32>
    %cst_44 = arith.constant 5.000000e-01 : f32
    %124 = vector.broadcast %cst_44 : f32 to vector<1x512xf32>
    %125 = arith.cmpf ogt, %123, %124 : vector<1x512xf32>
    %cst_45 = arith.constant 0.000000e+00 : f32
    %126 = vector.shape_cast %125 : vector<1x512xi1> to vector<1x512xi1>
    %127 = vector.broadcast %126 : vector<1x512xi1> to vector<8x512xi1>
    %128 = vector.broadcast %cst_45 : f32 to vector<8x512xf32>
    %129 = arith.select %127, %122, %128 : vector<8x512xi1>, vector<8x512xf32>
    %c495_i32_46 = arith.constant 495 : i32
    %130 = tpu.dynamic_rotate %73 by %c495_i32_46 dim 1 : vector<8x512xf32>, i32 -> vector<8x512xf32>
    %131 = vector.extract_strided_slice %2 {offsets = [8, 0], sizes = [1, 512], strides = [1, 1]} : vector<9x512xf32> to vector<1x512xf32>
    %cst_47 = arith.constant 5.000000e-01 : f32
    %132 = vector.broadcast %cst_47 : f32 to vector<1x512xf32>
    %133 = arith.cmpf ogt, %131, %132 : vector<1x512xf32>
    %cst_48 = arith.constant 0.000000e+00 : f32
    %134 = vector.shape_cast %133 : vector<1x512xi1> to vector<1x512xi1>
    %135 = vector.broadcast %134 : vector<1x512xi1> to vector<8x512xi1>
    %136 = vector.broadcast %cst_48 : f32 to vector<8x512xf32>
    %137 = arith.select %135, %130, %136 : vector<8x512xi1>, vector<8x512xf32>
    %138 = tpu.concatenate %81, %89, %97, %105, %73, %113, %121, %129, %137 in 0 : vector<8x512xf32>, vector<8x512xf32>, vector<8x512xf32>, vector<8x512xf32>, vector<8x512xf32>, vector<8x512xf32>, vector<8x512xf32>, vector<8x512xf32>, vector<8x512xf32> -> vector<72x512xf32>
    %c0_49 = arith.constant 0 : index
    %c0_50 = arith.constant 0 : index
    %139 = vector.load %arg5[%c0_49, %c0_50] : memref<8x72xf32, #tpu.memory_space<vmem>>, vector<8x72xf32>
    %cst_51 = arith.constant dense<0.000000e+00> : vector<8x512xf32>
    %140 = tpu.matmul %139, %138, %cst_51 {dimension_numbers = #tpu.dot_dimension_numbers<[1], [0], [0], [1], [0, 0, 1, 1], [], []>} : vector<8x72xf32>, vector<72x512xf32>, vector<8x512xf32> -> vector<8x512xf32>
    %c0_52 = arith.constant 0 : index
    %c0_53 = arith.constant 0 : index
    %141 = vector.load %arg6[%c0_52, %c0_53] : memref<8x1xf32, #tpu.memory_space<vmem>>, vector<8x1xf32>
    %142 = vector.broadcast %141 : vector<8x1xf32> to vector<8x512xf32>
    %143 = arith.addf %140, %142 : vector<8x512xf32>
    %144 = arith.addf %0, %143 : vector<8x512xf32>
    %c0_54 = arith.constant 0 : index
    %c0_55 = arith.constant 0 : index
    %145 = vector.load %arg8[%c0_54, %c0_55] : memref<8x512xf32, #tpu.memory_space<vmem>>, vector<8x512xf32>
    tpu.vector_store %arg8[%c0_54, %c0_55], %144 {strides = array<i32>} : memref<8x512xf32, #tpu.memory_space<vmem>>, vector<8x512xf32>,
    return
  }
  func.func @transform_0(%arg0: i32) -> (i32, i32) {
    %c0_i32 = arith.constant 0 : i32
    %c0_i32_0 = arith.constant 0 : i32
    return %c0_i32, %arg0 : i32, i32
  }
  func.func @transform_1(%arg0: i32) -> (i32, i32) {
    %c0_i32 = arith.constant 0 : i32
    %c0_i32_0 = arith.constant 0 : i32
    return %c0_i32, %arg0 : i32, i32
  }
  func.func @transform_2(%arg0: i32) -> (i32, i32) {
    %c0_i32 = arith.constant 0 : i32
    %c0_i32_0 = arith.constant 0 : i32
    %c0_i32_1 = arith.constant 0 : i32
    return %c0_i32, %c0_i32_0 : i32, i32
  }
  func.func @transform_3(%arg0: i32) -> (i32, i32) {
    %c0_i32 = arith.constant 0 : i32
    %c0_i32_0 = arith.constant 0 : i32
    %c0_i32_1 = arith.constant 0 : i32
    return %c0_i32, %c0_i32_0 : i32, i32
  }
  func.func @transform_4(%arg0: i32) -> (i32, i32) {
    %c0_i32 = arith.constant 0 : i32
    %c0_i32_0 = arith.constant 0 : i32
    %c0_i32_1 = arith.constant 0 : i32
    return %c0_i32, %c0_i32_0 : i32, i32
  }
  func.func @transform_5(%arg0: i32) -> (i32, i32) {
    %c0_i32 = arith.constant 0 : i32
    %c0_i32_0 = arith.constant 0 : i32
    %c0_i32_1 = arith.constant 0 : i32
    return %c0_i32, %c0_i32_0 : i32, i32
  }
  func.func @transform_6(%arg0: i32) -> (i32, i32) {
    %c0_i32 = arith.constant 0 : i32
    %c0_i32_0 = arith.constant 0 : i32
    %c0_i32_1 = arith.constant 0 : i32
    return %c0_i32, %c0_i32_0 : i32, i32
  }
  func.func @transform_7(%arg0: i32) -> (i32, i32) {
    %c0_i32 = arith.constant 0 : i32
    %c0_i32_0 = arith.constant 0 : i32
    return %c0_i32, %arg0 : i32, i32
  }
}

</mosaic_0001>

<bundles_post_ra>
// kernel: _mgite_tuple_forward.1
= control target key start
LH: loop header
LB: loop body
LE: loop exit
PB: predicated region body
PF: predicated region fallthrough
CT: control target
= control target key end

     0   :  { %v884_v2 = vmov 0   ;;  %s885_s28 = smov 111   ;;  %s886_s10 = smov 112   ;;  %v892_v5 = vmov 0.0   ;;  %v50_v7 = vlaneseq  ;;  %s1628_s0 = inlined_call_operand.vmem [shape: f32[8,512], index: 0, kind: input, shape index: {}, may-alias: {0,7}]   ;;  %s1629_s3 = inlined_call_operand.vmem [shape: f32[8,1], index: 3, kind: input, shape index: {}]   ;;  %s1630_s6 = inlined_call_operand.vmem [shape: f32[9,512], index: 6, kind: input, shape index: {}]   ;;  %s1631_s2 = inlined_call_operand.vmem [shape: f32[8,72], index: 2, kind: input, shape index: {}]   ;;  %s1632_s1 = inlined_call_operand.vmem [shape: f32[8,512], index: 1, kind: input, shape index: {}]   ;;  %s1633_s5 = inlined_call_operand.vmem [shape: f32[8,1], index: 5, kind: input, shape index: {}]   ;;  %s1634_s4 = inlined_call_operand.vmem [shape: f32[8,72], index: 4, kind: input, shape index: {}]   ;;  %s1635_s7 = inlined_call_operand.vmem [shape: f32[8,512], index: 7, kind: output, shape index: {}, may-alias: {0,7}]  }
   0x1   :  { %v937_v0 = vld [vmem:[%s1628_s0 + $0x10] sm:$0xff]  ;;  %v942_v1 = vld [vmem:[%s1628_s0] sm:$0xff]  ;;  %883 = vset.pattern.permute.xlu0 %v884_v2  ;;  %v952_v3 = vld [vmem:[%s1628_s0 + $0x18] sm:$0xff]  ;;  %s888_s11 = smov 127   ;;  %s889_s12 = smov 1   ;;  %431 = vmatprep.mubr.f32.mxu0 %v892_v5 }
   0x2   :  { %315 = vrot.lane.b32.xlu1 %v937_v0, %s885_s28  ;;  %311 = vrot.lane.b32.xlu0 %v942_v1, %s885_s28  ;;  %v957_v4 = vld [vmem:[%s1628_s0 + $0x8] sm:$0xff]  ;;  %s887_s0 = smov 113   ;;  %s890_s13 = smov 15   ;;  %v357_v6 = vld [vmem:[%s1629_s3] sm:$0xff]  ;;  %v1033_v11 = vshrl.u32 %v50_v7, 7  ;;  %v1048_v19 = vand.u32 127, %v50_v7 }
   0x3   :  { %s891_s14 = smov 16   ;;  %502 = vmatprep.mubr.f32.mxu1 %v892_v5  ;;  %s893_s15 = smov 17   ;;  %v39_v8 = vld [vmem:[%s1630_s6 + $0x28] sm:$0x1]  ;;  %v41_v9 = vld [vmem:[%s1630_s6 + $0x38] sm:$0x1] }
   0x4   :  { %v38_v10 = vld [vmem:[%s1630_s6 + $0x20] sm:$0x1]  ;;  %v40_v12 = vld [vmem:[%s1630_s6 + $0x30] sm:$0x1]  ;;  %vm325_vm0 = vcmp.gt.f32.partialorder %v39_v8, 0.5  ;;  %vm327_vm1 = vcmp.gt.f32.partialorder %v41_v9, 0.5 }
   0x5   :  { %vm324_vm2 = vcmp.gt.f32.partialorder %v38_v10, 0.5  ;;  %vm326_vm3 = vcmp.gt.f32.partialorder %v40_v12, 0.5  ;;  %v1039_v13 = vsub.s32 0, %v1033_v11  ;;  %v329_v14 = vsel %vm325_vm0, 1, %v884_v2  ;;  %v35_v18 = vld [vmem:[%s1630_s6 + $0x8] sm:$0xff]  ;;  %v37_v20 = vld [vmem:[%s1630_s6 + $0x18] sm:$0xff] }
   0x6   :  { %317 = vrot.lane.b32.xlu1 %v952_v3, %s885_s28  ;;  %313 = vrot.lane.b32.xlu0 %v957_v4, %s885_s28  ;;  %v331_v15 = vsel %vm327_vm1, 1, %v884_v2  ;;  %v328_v16 = vsel %vm324_vm2, 1, %v884_v2  ;;  %v330_v17 = vsel %vm326_vm3, 1, %v884_v2  ;;  %v34_v21 = vld [vmem:[%s1630_s6] sm:$0xff]  ;;  %v36_v22 = vld [vmem:[%s1630_s6 + $0x10] sm:$0xff]  ;;  %vm58_vm4 = vcmp.gt.f32.partialorder %v35_v18, 0.5 }
   0x7   :  { %v339_v23 = vrot.slane %v329_v14, %v1039_v13  ;;  %v347_v24 = vrot.slane %v331_v15, %v1039_v13  ;;  %v335_v25 = vrot.slane %v328_v16, %v1039_v13  ;;  %v343_v28 = vrot.slane %v330_v17, %v1039_v13 }
   0x8   :  { %vm60_vm5 = vcmp.gt.f32.partialorder %v37_v20, 0.5  ;;  %vm57_vm6 = vcmp.gt.f32.partialorder %v34_v21, 0.5  ;;  %vm59_vm7 = vcmp.gt.f32.partialorder %v36_v22, 0.5  ;;  %vm1638_vm8 = vcmp.lt.s32.totalorder %v1048_v19, 111 }
   0x9   :  { %v289_v29 = vsub.s32 7, %v1033_v11  ;;  %vm1065_vm9 = vcmp.eq.s32.totalorder %v339_v23, 1  ;;  %vm1069_vm10 = vcmp.eq.s32.totalorder %v347_v24, 1  ;;  %vm1073_vm11 = vcmp.eq.s32.totalorder %v335_v25, 1 }
   0xa   :  { %276 = vrot.lane.b32.xlu1 %v957_v4, %s886_s10  ;;  %274 = vrot.lane.b32.xlu0 %v942_v1, %s886_s10  ;;  %v1078_v33 = vsel %vm58_vm4, 1, %v884_v2  ;;  %vm1080_vm12 = vcmp.eq.s32.totalorder %v343_v28, 1  ;;  %v1085_v37 = vsel %vm60_vm5, 1, %v884_v2  ;;  %v1088_v38 = vsel %vm57_vm6, 1, %v884_v2 }
   0xb   :  { %v1091_v39 = vsel %vm59_vm7, 1, %v884_v2  ;;  %v294_v44 = vrot.slane %v1078_v33, %v289_v29  ;;  %v302_v45 = vrot.slane %v1085_v37, %v289_v29  ;;  %v290_v48 = vrot.slane %v1088_v38, %v289_v29 }
   0xc   :  { %v298_v49 = vrot.slane %v1091_v39, %v289_v29  ;;  %vm1637_vm13 = vcmp.lt.s32.totalorder %v1048_v19, 112  ;;  %v252_v52 = vsub.s32 6, %v1033_v11  ;;  %vm1636_vm2 = vcmp.lt.s32.totalorder %v1048_v19, 113 }
   0xd   :  { %vm1114_vm14 = vcmp.eq.s32.totalorder %v294_v44, 1  ;;  %vm1118_vm15 = vcmp.eq.s32.totalorder %v302_v45, 1  ;;  %vm1123_vm0 = vcmp.eq.s32.totalorder %v290_v48, 1  ;;  %v1681_v8 = vmov 0 }
   0xe   :  { %280 = vrot.lane.b32.xlu1 %v952_v3, %s886_s10  ;;  %278 = vrot.lane.b32.xlu0 %v937_v0, %s886_s10  ;;  %vm1127_vm1 = vcmp.eq.s32.totalorder %v298_v49, 1  ;;  %v257_v61 = vrot.slane %v1078_v33, %v252_v52  ;;  %v265_v62 = vrot.slane %v1085_v37, %v252_v52  ;;  %v261_v7 = vrot.slane %v1091_v39, %v252_v52 }
   0xf   :  { %v1683_v9 = vmov 0  ;;  %v215_v10 = vsub.s32 5, %v1033_v11  ;;  %v1685_v15 = vmov 0  ;;  %v1687_v16 = vmov 0 }
  0x10   :  { %vm1152_vm3 = vcmp.eq.s32.totalorder %v257_v61, 1  ;;  %vm1156_vm4 = vcmp.eq.s32.totalorder %v265_v62, 1  ;;  %vm1165_vm6 = vcmp.eq.s32.totalorder %v261_v7, 1  ;;  %v178_v24 = vsub.s32 3, %v1033_v11 }
  0x11   :  { %v1682_v8 = vsel %vm1152_vm3, 4294967295, %v1681_v8  ;;  %v1684_v9 = vsel %vm1156_vm4, 4294967295, %v1683_v9  ;;  %v1688_v16 = vsel %vm1165_vm6, 4294967295, %v1687_v16  ;;  %v220_v22 = vrot.slane %v1078_v33, %v215_v10 }
  0x12   :  { %239 = vrot.lane.b32.xlu1 %v957_v4, %s887_s0  ;;  %237 = vrot.lane.b32.xlu0 %v942_v1, %s887_s0  ;;  %v228_v23 = vrot.slane %v1085_v37, %v215_v10  ;;  %v224_v28 = vrot.slane %v1091_v39, %v215_v10  ;;  %vm1642_vm7 = vcmp.lt.s32.totalorder %v1048_v19, 127  ;;  %v1689_v29 = vmov 0 }
  0x13   :  { %v1697_v48 = vmov 0  ;;  %v179_v49 = vrot.slane %v1088_v38, %v178_v24 }
  0x16   :  { %243 = vrot.lane.b32.xlu1 %v952_v3, %s887_s0  ;;  %241 = vrot.lane.b32.xlu0 %v937_v0, %s887_s0 }
  0x1a   :  { %202 = vrot.lane.b32.xlu1 %v957_v4, %s888_s11  ;;  %200 = vrot.lane.b32.xlu0 %v942_v1, %s888_s11 }
  0x1e   :  { %206 = vrot.lane.b32.xlu1 %v952_v3, %s888_s11  ;;  %204 = vrot.lane.b32.xlu0 %v937_v0, %s888_s11 }
  0x22   :  { %165 = vrot.lane.b32.xlu1 %v957_v4, %s889_s12  ;;  %163 = vrot.lane.b32.xlu0 %v942_v1, %s889_s12 }
  0x26   :  { %169 = vrot.lane.b32.xlu1 %v952_v3, %s889_s12  ;;  %167 = vrot.lane.b32.xlu0 %v937_v0, %s889_s12 }
  0x2a   :  { %128 = vrot.lane.b32.xlu1 %v957_v4, %s890_s13  ;;  %126 = vrot.lane.b32.xlu0 %v942_v1, %s890_s13 }
  0x2e   :  { %132 = vrot.lane.b32.xlu1 %v952_v3, %s890_s13  ;;  %130 = vrot.lane.b32.xlu0 %v937_v0, %s890_s13 }
  0x32   :  { %91 = vrot.lane.b32.xlu1 %v957_v4, %s891_s14  ;;  %89 = vrot.lane.b32.xlu0 %v942_v1, %s891_s14 }
  0x36   :  { %95 = vrot.lane.b32.xlu1 %v952_v3, %s891_s14  ;;  %93 = vrot.lane.b32.xlu0 %v937_v0, %s891_s14 }
  0x3a   :  { %44 = vrot.lane.b32.xlu1 %v957_v4, %s893_s15  ;;  %42 = vrot.lane.b32.xlu0 %v942_v1, %s893_s15 }
  0x3e   :  { %48 = vrot.lane.b32.xlu1 %v952_v3, %s893_s15  ;;  %46 = vrot.lane.b32.xlu0 %v937_v0, %s893_s15 }
  0x42   :  { %360 = vperm.xlu0 %883, %v357_v6   ;;  %v253_v6 = vrot.slane %v1088_v38, %v252_v52  ;;  %v191_v52 = vrot.slane %v1085_v37, %v178_v24 }
  0x44   :  { %vm1161_vm5 = vcmp.eq.s32.totalorder %v253_v6, 1  ;;  %v1703_v6 = vmov 0 }
  0x45   :  { %v1686_v15 = vsel %vm1161_vm5, 4294967295, %v1685_v15 }
  0x74   :  { %v316_v26 = vpop.permute.xlu1 %315  ;;  %v312_v27 = vpop.permute.xlu0 %311 }
  0x78   :  { %v318_v34 = vpop.permute.xlu1 %317  ;;  %v314_v35 = vpop.permute.xlu0 %313 }
  0x79   :  { %v321_v40 = vsel %vm1638_vm8, %v314_v35, %v316_v26  ;;  %v323_v41 = vsel %vm1638_vm8, %v318_v34, %v312_v27  ;;  %v322_v42 = vsel %vm1638_vm8, %v312_v27, %v314_v35  ;;  %v320_v43 = vsel %vm1638_vm8, %v316_v26, %v318_v34 }
  0x7a   :  { %805 = vmatprep.subr.msk.mxu0 %vm1065_vm9, %v321_v40  ;;  %822 = vmatprep.subr.msk.mxu1 %vm1069_vm10, %v323_v41  ;;  %v216_v27 = vrot.slane %v1088_v38, %v215_v10  ;;  %v1691_v34 = vmov 0  ;;  %v183_v35 = vrot.slane %v1078_v33, %v178_v24 }
  0x7b   :  { %806 = vmatpush1.msk.msra.mxu0 %vm1073_vm11, %v322_v42  ;;  %823 = vmatpush1.msk.msra.mxu1 %vm1080_vm12, %v320_v43  ;;  %v1693_v42 = vmov 0  ;;  %v1695_v43 = vmov 0 }
  0x7c   :  { %v277_v46 = vpop.permute.xlu1 %276  ;;  %v275_v47 = vpop.permute.xlu0 %274  ;;  %vm1200_vm8 = vcmp.eq.s32.totalorder %v216_v27, 1 }
  0x7d   :  { %v285_v60 = vsel %vm1637_vm13, %v275_v47, %v277_v46  ;;  %v1694_v42 = vsel %vm1200_vm8, 4294967295, %v1693_v42 }
  0x80   :  { %v281_v53 = vpop.permute.xlu1 %280  ;;  %v279_v54 = vpop.permute.xlu0 %278 }
  0x81   :  { %v286_v57 = vsel %vm1637_vm13, %v281_v53, %v275_v47  ;;  %v283_v58 = vsel %vm1637_vm13, %v279_v54, %v281_v53  ;;  %v284_v59 = vsel %vm1637_vm13, %v277_v46, %v279_v54  ;;  %vm1195_vm13 = vcmp.eq.s32.totalorder %v228_v23, 1 }
  0x82   :  { %807 = vmatprep.subr.msk.mxu0 %vm1114_vm14, %v284_v59  ;;  %824 = vmatprep.subr.msk.mxu1 %vm1118_vm15, %v286_v57  ;;  %v1692_v34 = vsel %vm1195_vm13, 4294967295, %v1691_v34  ;;  %v141_v53 = vsub.s32 2, %v1033_v11 }
  0x83   :  { %808 = vmatpush1.msk.msra.mxu0 %vm1123_vm0, %v285_v60  ;;  %825 = vmatpush1.msk.msra.mxu1 %vm1127_vm1, %v283_v58  ;;  %v187_v58 = vrot.slane %v1091_v39, %v178_v24 }
  0x84   :  { %v240_v63 = vpop.permute.xlu1 %239  ;;  %v238_v2 = vpop.permute.xlu0 %237  ;;  %v146_v62 = vrot.slane %v1078_v33, %v141_v53  ;;  %v150_v23 = vrot.slane %v1091_v39, %v141_v53 }
  0x85   :  { %v248_v21 = vsel %vm1636_vm2, %v238_v2, %v240_v63 }
  0x88   :  { %v244_v12 = vpop.permute.xlu1 %243  ;;  %v242_v14 = vpop.permute.xlu0 %241 }
  0x89   :  { %v249_v17 = vsel %vm1636_vm2, %v244_v12, %v238_v2  ;;  %v246_v18 = vsel %vm1636_vm2, %v242_v14, %v244_v12  ;;  %v247_v20 = vsel %vm1636_vm2, %v240_v63, %v242_v14  ;;  %vm1191_vm2 = vcmp.eq.s32.totalorder %v220_v22, 1 }
  0x8a   :  { %809 = vmatprep.subr.msk.mxu0 %vm1152_vm3, %v247_v20  ;;  %826 = vmatprep.subr.msk.mxu1 %vm1156_vm4, %v249_v17  ;;  %v1690_v29 = vsel %vm1191_vm2, 4294967295, %v1689_v29  ;;  %vm1644_vm4 = vcmp.lt.s32.totalorder %v1048_v19, 1  ;;  %vm1267_vm3 = vcmp.eq.s32.totalorder %v146_v62, 1  ;;  %v1708_v14 = vmov 0 }
  0x8b   :  { %810 = vmatpush1.msk.msra.mxu0 %vm1161_vm5, %v248_v21  ;;  %827 = vmatpush1.msk.msra.mxu1 %vm1165_vm6, %v246_v18  ;;  %vm1204_vm6 = vcmp.eq.s32.totalorder %v224_v28, 1  ;;  %vm1225_vm5 = vcmp.eq.s32.totalorder %v183_v35, 1  ;;  %v1709_v14 = vsel %vm1267_vm3, 4294967295, %v1708_v14  ;;  %v142_v17 = vrot.slane %v1088_v38, %v141_v53 }
  0x8c   :  { %v203_v25 = vpop.permute.xlu1 %202  ;;  %v201_v26 = vpop.permute.xlu0 %200  ;;  %v1696_v43 = vsel %vm1204_vm6, 4294967295, %v1695_v43  ;;  %v1698_v48 = vsel %vm1225_vm5, 4294967295, %v1697_v48  ;;  %v154_v18 = vrot.slane %v1085_v37, %v141_v53  ;;  %v104_v20 = vsub.s32 1, %v1033_v11 }
  0x8d   :  { %v211_v47 = vsel %vm1642_vm7, %v201_v26, %v203_v25  ;;  %v1714_v35 = vmov 0 }
  0x8e   :  { %v109_v11 = vrot.slane %v1078_v33, %v104_v20  ;;  %v113_v53 = vrot.slane %v1091_v39, %v104_v20 }
  0x90   :  { %v207_v40 = vpop.permute.xlu1 %206  ;;  %v205_v41 = vpop.permute.xlu0 %204 }
  0x91   :  { %v212_v44 = vsel %vm1642_vm7, %v207_v40, %v201_v26  ;;  %v209_v45 = vsel %vm1642_vm7, %v205_v41, %v207_v40  ;;  %v210_v46 = vsel %vm1642_vm7, %v203_v25, %v205_v41  ;;  %vm1241_vm7 = vcmp.eq.s32.totalorder %v179_v49, 1 }
  0x92   :  { %811 = vmatprep.subr.msk.mxu0 %vm1191_vm2, %v210_v46  ;;  %828 = vmatprep.subr.msk.mxu1 %vm1195_vm13, %v212_v44  ;;  %vm1705_vm13 = vcmp.lt.s32.totalorder %v1048_v19, 1  ;;  %vm1652_vm2 = vcmp.lt.s32.totalorder %v1048_v19, 15  ;;  %v1710_v25 = vmov 0  ;;  %v1712_v26 = vmov 0 }
  0x93   :  { %812 = vmatpush1.msk.msra.mxu0 %vm1200_vm8, %v211_v47  ;;  %829 = vmatpush1.msk.msra.mxu1 %vm1204_vm6, %v209_v45  ;;  %vm1245_vm6 = vcmp.eq.s32.totalorder %v191_v52, 1  ;;  %v1716_v45 = vmov 0  ;;  %v105_v46 = vrot.slane %v1088_v38, %v104_v20  ;;  %v117_v47 = vrot.slane %v1085_v37, %v104_v20 }
  0x94   :  { %v166_v54 = vpop.permute.xlu1 %165  ;;  %389 = vmatprep.subr.mxu0 %v957_v4  ;;  %v164_v57 = vpop.permute.xlu0 %163  ;;  %460 = vmatprep.subr.mxu1 %v952_v3 }
  0x95   :  { %v174_v59 = vsel %vm1644_vm4, %v164_v57, %v166_v54  ;;  %390 = vmatpush1.msra.mxu0 %v942_v1  ;;  %461 = vmatpush1.msra.mxu1 %v937_v0  ;;  %vm1250_vm4 = vcmp.eq.s32.totalorder %v187_v58, 1  ;;  %v1720_v58 = vmov 0 }
  0x96   :  { %813 = vmatprep.subr.msk.mxu0 %vm1225_vm5, %v174_v59  ;;  %v1704_v6 = vsel %vm1250_vm4, 4294967295, %v1703_v6  ;;  %vm1706_vm5 = vmmov %vm1705_vm13  ;;  %v72_v59 = vrot.slane %v1078_v33, %v1039_v13 }
  0x97   :  { %vm1707_vm8 = vmmov %vm1706_vm5 }
  0x98   :  { %v170_v63 = vpop.permute.xlu1 %169  ;;  %v168_v2 = vpop.permute.xlu0 %167 }
  0x99   :  { %v175_v7 = vsel %vm1705_vm13, %v170_v63, %v164_v57  ;;  %v172_v10 = vsel %vm1706_vm5, %v168_v2, %v170_v63  ;;  %v173_v12 = vsel %vm1707_vm8, %v166_v54, %v168_v2  ;;  %vm1279_vm8 = vcmp.eq.s32.totalorder %v142_v17, 1 }
  0x9a   :  { %814 = vmatpush1.msk.msra.mxu0 %vm1241_vm7, %v175_v7  ;;  %830 = vmatprep.subr.msk.mxu1 %vm1245_vm6, %v172_v10  ;;  %v1711_v25 = vsel %vm1279_vm8, 4294967295, %v1710_v25  ;;  %vm1283_vm13 = vcmp.eq.s32.totalorder %v154_v18, 1  ;;  %vm1288_vm5 = vcmp.eq.s32.totalorder %v150_v23, 1  ;;  %v1718_v57 = vmov 0 }
  0x9b   :  { %831 = vmatpush1.msk.msra.mxu1 %vm1250_vm4, %v173_v12  ;;  %v1713_v26 = vsel %vm1283_vm13, 4294967295, %v1712_v26  ;;  %v1715_v35 = vsel %vm1288_vm5, 4294967295, %v1714_v35  ;;  %vm1305_vm4 = vcmp.eq.s32.totalorder %v109_v11, 1  ;;  %v1722_v2 = vmov 0 }
  0x9c   :  { %v129_v21 = vpop.permute.xlu1 %128  ;;  %v127_v22 = vpop.permute.xlu0 %126  ;;  %v1717_v45 = vsel %vm1305_vm4, 4294967295, %v1716_v45  ;;  %v68_v17 = vrot.slane %v1088_v38, %v1039_v13  ;;  %v80_v18 = vrot.slane %v1085_v37, %v1039_v13  ;;  %v1728_v38 = vmov 0 }
  0x9d   :  { %v137_v24 = vsel %vm1652_vm2, %v127_v22, %v129_v21 }
  0x9e   :  { %815 = vmatprep.subr.msk.mxu0 %vm1267_vm3, %v137_v24  ;;  %vm1657_vm3 = vcmp.lt.s32.totalorder %v1048_v19, 16 }
  0xa0   :  { %v133_v27 = vpop.permute.xlu1 %132  ;;  %v131_v28 = vpop.permute.xlu0 %130 }
  0xa1   :  { %v138_v40 = vsel %vm1652_vm2, %v133_v27, %v127_v22  ;;  %v135_v41 = vsel %vm1652_vm2, %v131_v28, %v133_v27  ;;  %v136_v44 = vsel %vm1652_vm2, %v129_v21, %v131_v28  ;;  %vm1316_vm2 = vcmp.eq.s32.totalorder %v105_v46, 1  ;;  %v30_v46 = vld [vmem:[%s1632_s1] sm:$0xff] }
  0xa2   :  { %816 = vmatpush1.msk.msra.mxu0 %vm1279_vm8, %v138_v40  ;;  %832 = vmatprep.subr.msk.mxu1 %vm1283_vm13, %v135_v41  ;;  %v1719_v57 = vsel %vm1316_vm2, 4294967295, %v1718_v57  ;;  %vm1326_vm13 = vcmp.eq.s32.totalorder %v113_v53, 1  ;;  %vm1343_vm8 = vcmp.eq.s32.totalorder %v72_v59, 1  ;;  %v76_v22 = vrot.slane %v1091_v39, %v1039_v13  ;;  %v356_v13 = vld [vmem:[%s1631_s2] sm:$0xff] }
  0xa3   :  { %833 = vmatpush1.msk.msra.mxu1 %vm1288_vm5, %v136_v44  ;;  %vm1320_vm5 = vcmp.eq.s32.totalorder %v117_v47, 1  ;;  %v1723_v2 = vsel %vm1326_vm13, 4294967295, %v1722_v2  ;;  %v1730_v39 = vmov 0 }
  0xa4   :  { %v92_v49 = vpop.permute.xlu1 %91  ;;  %v90_v52 = vpop.permute.xlu0 %89  ;;  %v1721_v58 = vsel %vm1320_vm5, 4294967295, %v1720_v58 }
  0xa5   :  { %v100_v54 = vsel %vm1657_vm3, %v90_v52, %v92_v49 }
  0xa6   :  { %817 = vmatprep.subr.msk.mxu0 %vm1305_vm4, %v100_v54  ;;  %vm1662_vm4 = vcmp.lt.s32.totalorder %v1048_v19, 17 }
  0xa8   :  { %v96_v62 = vpop.permute.xlu1 %95  ;;  %v94_v63 = vpop.permute.xlu0 %93 }
  0xa9   :  { %v101_v7 = vsel %vm1657_vm3, %v96_v62, %v90_v52  ;;  %v98_v10 = vsel %vm1657_vm3, %v94_v63, %v96_v62  ;;  %v99_v12 = vsel %vm1657_vm3, %v92_v49, %v94_v63  ;;  %vm1357_vm3 = vcmp.eq.s32.totalorder %v68_v17, 1  ;;  %v32_v49 = vld [vmem:[%s1632_s1 + $0x10] sm:$0xff]  ;;  %v33_v17 = vld [vmem:[%s1632_s1 + $0x18] sm:$0xff] }
  0xaa   :  { %818 = vmatpush1.msk.msra.mxu0 %vm1316_vm2, %v101_v7  ;;  %834 = vmatprep.subr.msk.mxu1 %vm1320_vm5, %v98_v10  ;;  %vm1661_vm5 = vcmask 588800   ;;  %vm1368_vm2 = vcmp.eq.s32.totalorder %v76_v22, 1 }
  0xab   :  { %835 = vmatpush1.msk.msra.mxu1 %vm1326_vm13, %v99_v12  ;;  %vm1361_vm13 = vcmp.eq.s32.totalorder %v80_v18, 1  ;;  %v1731_v39 = vsel %vm1368_vm2, 4294967295, %v1730_v39 }
  0xac   :  { %v45_v20 = vpop.permute.xlu1 %44  ;;  %v43_v21 = vpop.permute.xlu0 %42  ;;  %v1729_v38 = vsel %vm1361_vm13, 4294967295, %v1728_v38 }
  0xad   :  { %v55_v23 = vsel %vm1662_vm4, %v43_v21, %v45_v20 }
  0xae   :  { %819 = vmatprep.subr.msk.mxu0 %vm1343_vm8, %v55_v23 }
  0xb0   :  { %v49_v37 = vpop.permute.xlu1 %48  ;;  %v47_v11 = vpop.permute.xlu0 %46 }
  0xb1   :  { %v56_v27 = vsel %vm1662_vm4, %v49_v37, %v43_v21  ;;  %v53_v28 = vsel %vm1662_vm4, %v47_v11, %v49_v37  ;;  %v54_v40 = vsel %vm1662_vm4, %v45_v20, %v47_v11  ;;  %v642_v20 = vld [vmem:[%s1633_s5] sm:$0xff] }
  0xb2   :  { %820 = vmatpush1.msk.msra.mxu0 %vm1357_vm3, %v56_v27  ;;  %836 = vmatprep.subr.msk.mxu1 %vm1361_vm13, %v53_v28 }
  0xb3   :  { %821 = vmatmul.mubr.msk.f32.vlgmr.msra.gmra.mxu0 %vm1661_vm5, %v356_v13  ;;  %837 = vmatpush1.msk.msra.mxu1 %vm1368_vm2, %v54_v40 }
  0xb4   :  { %838 = vmatmul.mubr.msk.f32.vlgmr.msra.gmra.mxu1 %vm1661_vm5, %v356_v13  ;;  %715 = vmatprep.mubr.f32.mxu0 %v892_v5  ;;  %vm1732_vm5 = vcmp.lt.s32.totalorder %v1048_v19, 111 }
  0xb5   :  { %786 = vmatprep.mubr.f32.mxu1 %v892_v5  ;;  %v31_v5 = vld [vmem:[%s1632_s1 + $0x8] sm:$0xff]  ;;  %vm1733_vm4 = vmmov %vm1732_vm5 }
  0xb6   :  { %vm1734_vm2 = vmmov %vm1733_vm4 }
  0xb7   :  { %vm1735_vm13 = vmmov %vm1734_vm2 }
  0xbd   :  { %v361_v41 = vpop.permute.xlu0 %360 }
 0x173   :  { %v433_v44 = vpop.f32.mrf.mxu0 }
 0x174   :  { %v434_v47 = vadd.f32 %v433_v44, %v361_v41  ;;  %v504_v52 = vpop.f32.mrf.mxu1 }
 0x175   :  { %v505_v53 = vadd.f32 %v504_v52, %v361_v41  ;;  %v435_v54 = vpop.f32.mrf.mxu0 }
 0x176   :  { %v1394_v59 = vsub.f32 %v30_v46, %v434_v47  ;;  %v436_v62 = vadd.f32 %v435_v54, %v361_v41  ;;  %v506_v7 = vpop.f32.mrf.mxu1 }
 0x177   :  { %v1396_v63 = vsub.f32 %v32_v49, %v505_v53  ;;  %v507_v12 = vadd.f32 %v506_v7, %v361_v41 }
 0x178   :  { %625 = vrot.lane.b32.xlu1 %v1394_v59, %s885_s28  ;;  %v1405_v10 = vsub.f32 %v31_v5, %v436_v62 }
 0x179   :  { %629 = vrot.lane.b32.xlu0 %v1396_v63, %s885_s28  ;;  %v1414_v18 = vsub.f32 %v33_v17, %v507_v12 }
 0x17c   :  { %627 = vrot.lane.b32.xlu1 %v1405_v10, %s885_s28 }
 0x17d   :  { %609 = vrot.lane.b32.xlu0 %v1394_v59, %s886_s10 }
 0x180   :  { %631 = vrot.lane.b32.xlu1 %v1414_v18, %s885_s28 }
 0x181   :  { %613 = vrot.lane.b32.xlu0 %v1396_v63, %s886_s10 }
 0x184   :  { %611 = vrot.lane.b32.xlu1 %v1405_v10, %s886_s10 }
 0x185   :  { %593 = vrot.lane.b32.xlu0 %v1394_v59, %s887_s0 }
 0x188   :  { %615 = vrot.lane.b32.xlu1 %v1414_v18, %s886_s10 }
 0x189   :  { %597 = vrot.lane.b32.xlu0 %v1396_v63, %s887_s0 }
 0x18c   :  { %595 = vrot.lane.b32.xlu1 %v1405_v10, %s887_s0 }
 0x18d   :  { %577 = vrot.lane.b32.xlu0 %v1394_v59, %s888_s11 }
 0x190   :  { %599 = vrot.lane.b32.xlu1 %v1414_v18, %s887_s0 }
 0x191   :  { %581 = vrot.lane.b32.xlu0 %v1396_v63, %s888_s11 }
 0x194   :  { %579 = vrot.lane.b32.xlu1 %v1405_v10, %s888_s11 }
 0x195   :  { %561 = vrot.lane.b32.xlu0 %v1394_v59, %s889_s12 }
 0x198   :  { %583 = vrot.lane.b32.xlu1 %v1414_v18, %s888_s11 }
 0x199   :  { %565 = vrot.lane.b32.xlu0 %v1396_v63, %s889_s12 }
 0x19c   :  { %563 = vrot.lane.b32.xlu1 %v1405_v10, %s889_s12 }
 0x19d   :  { %545 = vrot.lane.b32.xlu0 %v1394_v59, %s890_s13 }
 0x1a0   :  { %567 = vrot.lane.b32.xlu1 %v1414_v18, %s889_s12 }
 0x1a1   :  { %549 = vrot.lane.b32.xlu0 %v1396_v63, %s890_s13 }
 0x1a4   :  { %547 = vrot.lane.b32.xlu1 %v1405_v10, %s890_s13 }
 0x1a5   :  { %529 = vrot.lane.b32.xlu0 %v1394_v59, %s891_s14 }
 0x1a8   :  { %551 = vrot.lane.b32.xlu1 %v1414_v18, %s890_s13 }
 0x1a9   :  { %533 = vrot.lane.b32.xlu0 %v1396_v63, %s891_s14 }
 0x1ac   :  { %531 = vrot.lane.b32.xlu1 %v1405_v10, %s891_s14 }
 0x1ad   :  { %513 = vrot.lane.b32.xlu0 %v1394_v59, %s893_s15 }
 0x1b0   :  { %535 = vrot.lane.b32.xlu1 %v1414_v18, %s891_s14 }
 0x1b1   :  { %517 = vrot.lane.b32.xlu0 %v1396_v63, %s893_s15 }
 0x1b4   :  { %515 = vrot.lane.b32.xlu1 %v1405_v10, %s893_s15 }
 0x1b5   :  { %645 = vperm.xlu0 %883, %v642_v20  }
 0x1b8   :  { %519 = vrot.lane.b32.xlu1 %v1414_v18, %s893_s15 }
 0x1ea   :  { %v626_v21 = vpop.permute.xlu1 %625 }
 0x1eb   :  { %v630_v22 = vpop.permute.xlu0 %629 }
 0x1ee   :  { %v628_v23 = vpop.permute.xlu1 %627 }
 0x1ef   :  { %v634_v37 = vsel %vm1732_vm5, %v628_v23, %v630_v22  ;;  %v635_v11 = vsel %vm1733_vm4, %v626_v21, %v628_v23  ;;  %v610_v13 = vpop.permute.xlu0 %609  ;;  %vm1743_vm4 = vnez %v1686_v15  ;;  %vm1747_vm5 = vnez %v1688_v16 }
 0x1f0   :  { %839 = vmatprep.subr.msk.mxu0 %vm1065_vm9, %v634_v37  ;;  %vm1736_vm9 = vcmp.lt.s32.totalorder %v1048_v19, 112 }
 0x1f1   :  { %840 = vmatpush1.msk.msra.mxu0 %vm1073_vm11, %v635_v11  ;;  %vm1737_vm11 = vmmov %vm1736_vm9 }
 0x1f2   :  { %v632_v27 = vpop.permute.xlu1 %631 }
 0x1f3   :  { %v633_v28 = vsel %vm1734_vm2, %v630_v22, %v632_v27  ;;  %v636_v40 = vsel %vm1735_vm13, %v632_v27, %v626_v21  ;;  %v614_v41 = vpop.permute.xlu0 %613  ;;  %vm1742_vm2 = vnez %v1682_v8  ;;  %vm1746_vm13 = vnez %v1684_v9 }
 0x1f4   :  { %856 = vmatprep.subr.msk.mxu1 %vm1069_vm10, %v636_v40  ;;  %vm1738_vm10 = vmmov %vm1736_vm9 }
 0x1f5   :  { %857 = vmatpush1.msk.msra.mxu1 %vm1080_vm12, %v633_v28  ;;  %vm1739_vm12 = vmmov %vm1736_vm9 }
 0x1f6   :  { %v612_v44 = vpop.permute.xlu1 %611 }
 0x1f7   :  { %v618_v30 = vsel %vm1736_vm9, %v612_v44, %v614_v41  ;;  %v619_v32 = vsel %vm1737_vm11, %v610_v13, %v612_v44  ;;  %v594_v46 = vpop.permute.xlu0 %593  ;;  %vm1748_vm9 = vcmp.lt.s32.totalorder %v1048_v19, 127 }
 0x1f8   :  { %841 = vmatprep.subr.msk.mxu0 %vm1114_vm14, %v618_v30  ;;  %vm1740_vm14 = vcmp.lt.s32.totalorder %v1048_v19, 113  ;;  %vm1749_vm11 = vmmov %vm1748_vm9 }
 0x1f9   :  { %842 = vmatpush1.msk.msra.mxu0 %vm1123_vm0, %v619_v32  ;;  %vm1741_vm0 = vmmov %vm1740_vm14 }
 0x1fa   :  { %v616_v47 = vpop.permute.xlu1 %615 }
 0x1fb   :  { %v617_v31 = vsel %vm1738_vm10, %v614_v41, %v616_v47  ;;  %v620_v36 = vsel %vm1739_vm12, %v616_v47, %v610_v13  ;;  %v598_v49 = vpop.permute.xlu0 %597  ;;  %vm1750_vm10 = vnez %v1690_v29  ;;  %vm1751_vm12 = vnez %v1694_v42 }
 0x1fc   :  { %858 = vmatprep.subr.msk.mxu1 %vm1118_vm15, %v620_v36  ;;  %vm1744_vm15 = vmmov %vm1741_vm0 }
 0x1fd   :  { %859 = vmatpush1.msk.msra.mxu1 %vm1127_vm1, %v617_v31  ;;  %vm1745_vm1 = vmmov %vm1741_vm0 }
 0x1fe   :  { %v596_v52 = vpop.permute.xlu1 %595 }
 0x1ff   :  { %v602_v50 = vsel %vm1740_vm14, %v596_v52, %v598_v49  ;;  %v603_v55 = vsel %vm1741_vm0, %v594_v46, %v596_v52  ;;  %v578_v53 = vpop.permute.xlu0 %577  ;;  %vm1752_vm14 = vmmov %vm1748_vm9 }
 0x200   :  { %843 = vmatprep.subr.msk.mxu0 %vm1742_vm2, %v602_v50  ;;  %vm1753_vm0 = vmmov %vm1748_vm9  ;;  %vm1754_vm2 = vnez %v1692_v34 }
 0x201   :  { %844 = vmatpush1.msk.msra.mxu0 %vm1743_vm4, %v603_v55  ;;  %vm1755_vm4 = vnez %v1696_v43 }
 0x202   :  { %v600_v54 = vpop.permute.xlu1 %599 }
 0x203   :  { %v601_v51 = vsel %vm1744_vm15, %v598_v49, %v600_v54  ;;  %v604_v56 = vsel %vm1745_vm1, %v600_v54, %v594_v46  ;;  %v582_v62 = vpop.permute.xlu0 %581  ;;  %vm1756_vm15 = vcmp.lt.s32.totalorder %v1048_v19, 1  ;;  %vm1757_vm1 = vnez %v1698_v48 }
 0x204   :  { %860 = vmatprep.subr.msk.mxu1 %vm1746_vm13, %v604_v56  ;;  %vm1758_vm13 = vmmov %vm1756_vm15 }
 0x205   :  { %861 = vmatpush1.msk.msra.mxu1 %vm1747_vm5, %v601_v51  ;;  %vm1759_vm5 = vmmov %vm1758_vm13 }
 0x206   :  { %v580_v5 = vpop.permute.xlu1 %579 }
 0x207   :  { %v586_v8 = vsel %vm1748_vm9, %v580_v5, %v582_v62  ;;  %v587_v15 = vsel %vm1749_vm11, %v578_v53, %v580_v5  ;;  %v562_v7 = vpop.permute.xlu0 %561  ;;  %vm1760_vm9 = vmmov %vm1759_vm5  ;;  %vm1761_vm11 = vnez %v1704_v6 }
 0x208   :  { %845 = vmatprep.subr.msk.mxu0 %vm1750_vm10, %v586_v8  ;;  %vm1762_vm10 = vcmp.lt.s32.totalorder %v1048_v19, 15 }
 0x209   :  { %846 = vmatpush1.msk.msra.mxu0 %vm1751_vm12, %v587_v15  ;;  %vm1763_vm12 = vnez %v1709_v14 }
 0x20a   :  { %673 = vmatprep.subr.mxu0 %v1405_v10  ;;  %v584_v9 = vpop.permute.xlu1 %583 }
 0x20b   :  { %v585_v16 = vsel %vm1752_vm14, %v582_v62, %v584_v9  ;;  %v588_v12 = vsel %vm1753_vm0, %v584_v9, %v578_v53  ;;  %v566_v17 = vpop.permute.xlu0 %565  ;;  %674 = vmatpush1.msra.mxu0 %v1394_v59  ;;  %vm1764_vm14 = vmmov %vm1762_vm10  ;;  %vm1767_vm0 = vnez %v1711_v25 }
 0x20c   :  { %862 = vmatprep.subr.msk.mxu1 %vm1754_vm2, %v588_v12  ;;  %vm1768_vm2 = vnez %v1713_v26 }
 0x20d   :  { %863 = vmatpush1.msk.msra.mxu1 %vm1755_vm4, %v585_v16  ;;  %vm1769_vm4 = vnez %v1715_v35 }
 0x20e   :  { %744 = vmatprep.subr.mxu1 %v1414_v18  ;;  %v564_v29 = vpop.permute.xlu1 %563 }
 0x20f   :  { %v571_v42 = vsel %vm1756_vm15, %v562_v7, %v564_v29  ;;  %v546_v10 = vpop.permute.xlu0 %545  ;;  %745 = vmatpush1.msra.mxu1 %v1396_v63  ;;  %v570_v18 = vsel %vm1760_vm9, %v564_v29, %v566_v17  ;;  %vm1770_vm15 = vcmp.lt.s32.totalorder %v1048_v19, 16 }
 0x210   :  { %847 = vmatprep.subr.msk.mxu0 %vm1757_vm1, %v571_v42  ;;  %vm1771_vm1 = vnez %v1717_v45 }
 0x212   :  { %v568_v20 = vpop.permute.xlu1 %567 }
 0x213   :  { %v569_v34 = vsel %vm1758_vm13, %v566_v17, %v568_v20  ;;  %v572_v43 = vsel %vm1759_vm5, %v568_v20, %v562_v7  ;;  %v550_v59 = vpop.permute.xlu0 %549  ;;  %vm1772_vm13 = vmmov %vm1770_vm15 }
 0x214   :  { %848 = vmatpush1.msk.msra.mxu0 %vm1241_vm7, %v572_v43  ;;  %864 = vmatprep.subr.msk.mxu1 %vm1245_vm6, %v569_v34  ;;  %vm1765_vm7 = vmmov %vm1762_vm10 }
 0x215   :  { %865 = vmatpush1.msk.msra.mxu1 %vm1761_vm11, %v570_v18  ;;  %vm1766_vm6 = vmmov %vm1765_vm7  ;;  %vm1775_vm11 = vnez %v1719_v57  ;;  %v641_v57 = vld [vmem:[%s1634_s4] sm:$0xff] }
 0x216   :  { %v548_v48 = vpop.permute.xlu1 %547  ;;  %vm1773_vm5 = vmmov %vm1772_vm13 }
 0x217   :  { %v555_v63 = vsel %vm1762_vm10, %v546_v10, %v548_v48  ;;  %v530_v21 = vpop.permute.xlu0 %529  ;;  %v554_v61 = vsel %vm1766_vm6, %v548_v48, %v550_v59  ;;  %vm1774_vm9 = vmmov %vm1773_vm5  ;;  %vm1776_vm10 = vnez %v1721_v58 }
 0x218   :  { %849 = vmatprep.subr.msk.mxu0 %vm1763_vm12, %v555_v63  ;;  %vm1777_vm12 = vnez %v1723_v2 }
 0x21a   :  { %v552_v22 = vpop.permute.xlu1 %551 }
 0x21b   :  { %v553_v23 = vsel %vm1764_vm14, %v550_v59, %v552_v22  ;;  %v556_v60 = vsel %vm1765_vm7, %v552_v22, %v546_v10  ;;  %v534_v6 = vpop.permute.xlu0 %533  ;;  %vm1778_vm14 = vcmp.lt.s32.totalorder %v1048_v19, 17 }
 0x21c   :  { %850 = vmatpush1.msk.msra.mxu0 %vm1767_vm0, %v556_v60  ;;  %866 = vmatprep.subr.msk.mxu1 %vm1768_vm2, %v553_v23  ;;  %vm1779_vm7 = vmmov %vm1778_vm14  ;;  %vm1783_vm2 = vcmask 588800  }
 0x21d   :  { %867 = vmatpush1.msk.msra.mxu1 %vm1769_vm4, %v554_v61  ;;  %vm1780_vm6 = vmmov %vm1779_vm7  ;;  %vm1784_vm4 = vnez %v1731_v39 }
 0x21e   :  { %v532_v14 = vpop.permute.xlu1 %531  ;;  %vm1781_vm0 = vmmov %vm1780_vm6 }
 0x21f   :  { %v539_v37 = vsel %vm1770_vm15, %v530_v21, %v532_v14  ;;  %v538_v26 = vsel %vm1774_vm9, %v532_v14, %v534_v6  ;;  %v514_v35 = vpop.permute.xlu0 %513  ;;  %vm1785_vm15 = vmmov %vm1783_vm2 }
 0x220   :  { %851 = vmatprep.subr.msk.mxu0 %vm1771_vm1, %v539_v37 }
 0x222   :  { %v536_v11 = vpop.permute.xlu1 %535 }
 0x223   :  { %v537_v13 = vsel %vm1772_vm13, %v534_v6, %v536_v11  ;;  %v540_v25 = vsel %vm1773_vm5, %v536_v11, %v530_v21  ;;  %v518_v28 = vpop.permute.xlu0 %517 }
 0x224   :  { %852 = vmatpush1.msk.msra.mxu0 %vm1775_vm11, %v540_v25  ;;  %868 = vmatprep.subr.msk.mxu1 %vm1776_vm10, %v537_v13 }
 0x225   :  { %869 = vmatpush1.msk.msra.mxu1 %vm1777_vm12, %v538_v26 }
 0x226   :  { %v516_v45 = vpop.permute.xlu1 %515 }
 0x227   :  { %v523_v27 = vsel %vm1778_vm14, %v514_v35, %v516_v45  ;;  %v522_v41 = vsel %vm1781_vm0, %v516_v45, %v518_v28 }
 0x228   :  { %853 = vmatprep.subr.msk.mxu0 %vm1343_vm8, %v523_v27  ;;  %vm1782_vm8 = vnez %v1729_v38 }
 0x22a   :  { %v520_v40 = vpop.permute.xlu1 %519 }
 0x22b   :  { %v521_v58 = vsel %vm1779_vm7, %v518_v28, %v520_v40  ;;  %v524_v2 = vsel %vm1780_vm6, %v520_v40, %v514_v35 }
 0x22c   :  { %854 = vmatpush1.msk.msra.mxu0 %vm1357_vm3, %v524_v2  ;;  %870 = vmatprep.subr.msk.mxu1 %vm1782_vm8, %v521_v58 }
 0x22d   :  { %855 = vmatmul.mubr.msk.f32.vlgmr.msra.gmra.mxu0 %vm1783_vm2, %v641_v57  ;;  %871 = vmatpush1.msk.msra.mxu1 %vm1784_vm4, %v522_v41 }
 0x22e   :  { %872 = vmatmul.mubr.msk.f32.vlgmr.msra.gmra.mxu1 %vm1785_vm15, %v641_v57 }
 0x230   :  { %v646_v33 = vpop.permute.xlu0 %645 }
 0x2ed   :  { %v717_v44 = vpop.f32.mrf.mxu0 }
 0x2ee   :  { %v718_v30 = vadd.f32 %v717_v44, %v646_v33  ;;  %v788_v32 = vpop.f32.mrf.mxu1 }
 0x2ef   :  { %v789_v46 = vadd.f32 %v788_v32, %v646_v33  ;;  %v719_v19 = vpop.f32.mrf.mxu0 }
 0x2f0   :  { %v793_v47 = vadd.f32 %v718_v30, %v942_v1  ;;  %v720_v24 = vadd.f32 %v719_v19, %v646_v33  ;;  %v790_v31 = vpop.f32.mrf.mxu1 }
 0x2f1   :  { %v795_v38 = vadd.f32 %v789_v46, %v937_v0  ;;  %v791_v36 = vadd.f32 %v790_v31, %v646_v33 }
 0x2f2   :  { %797 = vst [vmem:[%s1635_s7] sm:$0xff] %v793_v47  ;;  %v794_v39 = vadd.f32 %v720_v24, %v957_v4 }
 0x2f3   :  { %799 = vst [vmem:[%s1635_s7 + $0x10] sm:$0xff] %v795_v38  ;;  %v796_v49 = vadd.f32 %v791_v36, %v952_v3 }
 0x2f4   :  { %798 = vst [vmem:[%s1635_s7 + $0x8] sm:$0xff] %v794_v39 }
 0x2f5   :  { %800 = vst [vmem:[%s1635_s7 + $0x18] sm:$0xff] %v796_v49 }

</bundles_post_ra>
